<compile_context>
chip_gen: v7x
topology: tpu7x:2x2x1
jax: 0.10.0
libtpu: 0.0.40
codegen_flags: <defaults>
</compile_context>

<pallas_src>
import math

import jax
import jax.numpy as jnp
from jax import lax
from jax.experimental import pallas as pl
from jax.experimental.pallas import tpu as pltpu


# ---------------------------------------------------------------------------
# Fused Pallas kernel: all layers, both directions, whole sequence.
# ---------------------------------------------------------------------------
def _make_fused_kernel(T, B_pad, H, num_layers):
    H2 = 2 * H

    def rev_blocks(a):
        """Reverse the time-block order of a (T*B_pad, C) array.

        Static, 8-sublane-aligned slices + one axis-0 concat; vectorized, never inside
        the serial recurrence.
        """
        if T == 1:
            return a
        return jnp.concatenate(
            [a[(T - 1 - t) * B_pad:(T - t) * B_pad, :] for t in range(T)], axis=0)

    def kernel(*refs):
        x_ref = refs[0]                          # (T*B_pad, D0), time-major input
        w_refs = refs[1:1 + 4 * num_layers]      # per layer: w_a, w_r, w_rec, b
        out_ref = refs[1 + 4 * num_layers]       # (T*B_pad, 2H), time-aligned [fwd | bwd]
        act_ref = refs[2 + 4 * num_layers]       # VMEM scratch, packed iteration-order acts

        for layer in range(num_layers):
            # Hoisted weight/bias loads: once per layer, never inside the time loop.
            w_a = w_refs[4 * layer][...]         # (D_l, 2H) applied to the packed stream
            w_r = w_refs[4 * layer + 1][...]     # (D_l, 2H) applied to the block-reversed stream
            w_rec = w_refs[4 * layer + 2][...]   # (2H, 2H)  blockdiag(Whh_f^T, Whh_b^T)
            b = w_refs[4 * layer + 3][...]       # (1, 2H)   [b_ih_f+b_hh_f | b_ih_b+b_hh_b]

            # Whole-sequence input projection for BOTH directions, hoisted out of the
            # recurrence.  With the wrapper's weight packing, block t of `proj` is
            # [ fwd-direction preactivation at time t | bwd-direction preactivation at T-1-t ],
            # i.e. already in the packed iteration order the serial loop consumes.
            src = x_ref[...] if layer == 0 else act_ref[...]
            proj = (jnp.dot(src, w_a, preferred_element_type=jnp.float32)
                    + jnp.dot(rev_blocks(src), w_r, preferred_element_type=jnp.float32)
                    + b)                         # (T*B_pad, 2H)

            # Packed carry h = [h_f(t) | h_b(T-1-t)]: one blockdiag matmul, one tanh and one
            # 2H-lane store per step (fwd + bwd fused on the serial critical path).
            h = jnp.zeros((B_pad, H2), jnp.float32)
            # TODO(synk): for production-sized T, spill `proj` into a VMEM scratch ref and run
            # this with lax.fori_loop(unroll=4) reading proj_ref[pl.ds(...)], instead of a full
            # static unroll (code-size / vreg-live-range hazard at large T).
            for t in range(T):
                r = t * B_pad
                h = jnp.tanh(proj[r:r + B_pad, :]
                             + jnp.dot(h, w_rec, preferred_element_type=jnp.float32))
                act_ref[r:r + B_pad, :] = h      # single packed store per step

            # Packed activations in act_ref feed the next layer's projection directly
            # (the time reversal of the bwd half is folded into that layer's w_a / w_r).

        # Final un-pack (once, vectorized): fwd half is already time-aligned, bwd half is
        # stored block-reversed.
        out_ref[:, 0:H] = act_ref[:, 0:H]
        out_ref[:, H:H2] = rev_blocks(act_ref[:, H:H2])

    return kernel


# ---------------------------------------------------------------------------
# Weight packing (wrapper-side, one-time):
#   layer 0:   w_a = [Wih_f^T | 0],            w_r = [0 | Wih_b^T]
#   layer l>0: w_a = [[Wf1, 0], [0, Wb2]],     w_r = [[0, Wb1], [Wf2, 0]]
#     where Wih_f^T = [Wf1; Wf2] (rows for fwd/bwd input features), same for Wih_b^T.
#   w_rec = blockdiag(Whh_f^T, Whh_b^T),  b = [b_ih_f+b_hh_f | b_ih_b+b_hh_b]
# ---------------------------------------------------------------------------
def _pack_params(params, H):
    H2 = 2 * H
    packed = []
    for li, p in enumerate(params):
        D = p["wih_f"].shape[1]
        wih_f_t = p["wih_f"].T.astype(jnp.float32)      # (D, H)
        wih_b_t = p["wih_b"].T.astype(jnp.float32)      # (D, H)
        if li == 0:
            zcol = jnp.zeros((D, H), jnp.float32)
            w_a = jnp.concatenate([wih_f_t, zcol], axis=1)
            w_r = jnp.concatenate([zcol, wih_b_t], axis=1)
        else:
            # D == 2H; previous-layer input features ordered [fwd | bwd], time-aligned.
            w_a = jnp.zeros((D, H2), jnp.float32)
            w_a = w_a.at[0:H, 0:H].set(wih_f_t[0:H]).at[H:H2, H:H2].set(wih_b_t[H:H2])
            w_r = jnp.zeros((D, H2), jnp.float32)
            w_r = w_r.at[H:H2, 0:H].set(wih_f_t[H:H2]).at[0:H, H:H2].set(wih_b_t[0:H])
        w_rec = jnp.zeros((H2, H2), jnp.float32)
        w_rec = w_rec.at[0:H, 0:H].set(p["whh_f"].T).at[H:H2, H:H2].set(p["whh_b"].T)
        bias = jnp.concatenate([p["b_ih_f"] + p["b_hh_f"],
                                p["b_ih_b"] + p["b_hh_b"]]).reshape(1, H2)
        packed += [w_a, w_r, w_rec, bias]
    return packed


# ---------------------------------------------------------------------------
# Wrapper: batch_first (B, T, D) in/out like nn.RNN(batch_first=True, bidirectional=True).
# ---------------------------------------------------------------------------
def decoder_bdrnn_forward(x, params):
    """x: (B, T, hidden_size*2). Returns (B, T, output_size)."""
    B, T, D0 = x.shape
    H = params[0]["whh_f"].shape[0]
    H2 = 2 * H
    num_layers = len(params)

    # Pad batch to a sublane multiple: keeps every in-kernel row slice/store tile aligned
    # and gives the per-step matmuls >= 8 MXU rows.  Padded rows evolve independently
    # (all math is row-wise) and are sliced off at the end.
    B_pad = max(8, ((B + 7) // 8) * 8)

    x_tm = jnp.transpose(x, (1, 0, 2)).astype(jnp.float32)           # (T, B, D0)
    if B_pad != B:
        x_tm = jnp.pad(x_tm, ((0, 0), (0, B_pad - B), (0, 0)))       # (T, B_pad, D0)
    x_flat = x_tm.reshape(T * B_pad, D0)

    flat_args = [x_flat] + _pack_params(params, H)

    vmem = pl.BlockSpec(memory_space=pltpu.MemorySpace.VMEM)
    kernel = _make_fused_kernel(T, B_pad, H, num_layers)

    # Explicit VMEM budget: x + packed activations + output + proj temp + weights (+headroom).
    # At production T/B, tile T (and batch on v7x) with a grid instead of raising this.
    resident_bytes = T * B_pad * (D0 + 3 * H2) * 4
    for a in flat_args[1:]:
        resident_bytes += a.size * 4
    vmem_limit = int(min(48 * 1024 * 1024, max(8 * 1024 * 1024, 2 * resident_bytes)))

    # TODO(synk): for production B_pad >= 16, add a batch-tiled grid axis with
    # dimension_semantics=("parallel",) so v7x's second TensorCore gets half the batch, and
    # emit batch-major output from the kernel so the epilogue reshape/transpose disappears.
    y = pl.pallas_call(
        kernel,
        out_shape=jax.ShapeDtypeStruct((T * B_pad, H2), jnp.float32),
        in_specs=[vmem] * len(flat_args),
        out_specs=vmem,
        scratch_shapes=[pltpu.VMEM((T * B_pad, H2), jnp.float32)],
        compiler_params=pltpu.CompilerParams(vmem_limit_bytes=vmem_limit),
    )(*flat_args)

    y = y.reshape(T, B_pad, H2)[:, :B, :]                            # (T, B, 2H)
    return jnp.transpose(y, (1, 0, 2))                               # (B, T, output_size)


# ---------------------------------------------------------------------------
# Params (deterministic init matching nn.RNN's U(-1/sqrt(H), 1/sqrt(H))), stored raw.
# ---------------------------------------------------------------------------
def init_params(key, hidden_size, output_size, num_layers):
    H = output_size // 2
    bound = 1.0 / math.sqrt(H)
    params = []
    for layer in range(num_layers):
        D = hidden_size * 2 if layer == 0 else 2 * H
        key, *ks = jax.random.split(key, 9)

        def u(k_, shape):
            return jax.random.uniform(k_, shape, jnp.float32, -bound, bound)

        params.append(dict(
            wih_f=u(ks[0], (H, D)), whh_f=u(ks[1], (H, H)),
            b_ih_f=u(ks[2], (H,)), b_hh_f=u(ks[3], (H,)),
            wih_b=u(ks[4], (H, D)), whh_b=u(ks[5], (H, H)),
            b_ih_b=u(ks[6], (H,)), b_hh_b=u(ks[7], (H,)),
        ))
    return params


# ---------------------------------------------------------------------------
# Pure-JAX reference (same math as torch.nn.RNN, bidirectional, tanh, h0 = 0).
# ---------------------------------------------------------------------------
def decoder_bdrnn_reference(x, params):
    hp = lax.Precision.HIGHEST
    h_seq = jnp.transpose(x, (1, 0, 2)).astype(jnp.float32)          # (T, B, D)

    def run_dir(seq, wih, whh, bias):
        Bn = seq.shape[1]
        Hn = whh.shape[0]

        def step(h, xt):
            h_new = jnp.tanh(jnp.dot(xt, wih.T, precision=hp)
                             + jnp.dot(h, whh.T, precision=hp) + bias)
            return h_new, h_new

        _, ys = lax.scan(step, jnp.zeros((Bn, Hn), jnp.float32), seq)
        return ys

    for p in params:
        y_f = run_dir(h_seq, p["wih_f"], p["whh_f"], p["b_ih_f"] + p["b_hh_f"])
        y_b = jnp.flip(
            run_dir(jnp.flip(h_seq, 0), p["wih_b"], p["whh_b"], p["b_ih_b"] + p["b_hh_b"]), 0)
        h_seq = jnp.concatenate([y_f, y_b], axis=-1)
    return jnp.transpose(h_seq, (1, 0, 2))


if __name__ == "__main__":
    hidden_size = 32       # -> RNN input size = 64
    output_size = 32       # -> per-direction hidden = 16, output feature dim = 32
    num_layers = 2
    B, T = 2, 8

    key = jax.random.PRNGKey(0)
    key, xkey = jax.random.split(key)
    x = jax.random.normal(xkey, (B, T, hidden_size * 2), jnp.float32)

    params = init_params(key, hidden_size, output_size, num_layers)

    pred = jax.block_until_ready(decoder_bdrnn_forward(x, params))
    ref = jax.block_until_ready(decoder_bdrnn_reference(x, params))

    assert pred.shape == (B, T, output_size), pred.shape
    assert jnp.allclose(pred, ref, atol=1e-4, rtol=1e-4), \
        float(jnp.max(jnp.abs(pred - ref)))

    # TODO(synk): optional bf16 cast of the (non-serial) input-projection operands for
    # v6e/v7x MXU throughput once a looser tolerance is acceptable.
    print("KERNEL_OK")
</pallas_src>

<mosaic_0001>
module attributes {stable_mosaic.version = 11 : i64} {
  func.func @kernel(%arg0: memref<64x64xf32, #tpu.memory_space<vmem>>, %arg1: memref<64x32xf32, #tpu.memory_space<vmem>>, %arg2: memref<64x32xf32, #tpu.memory_space<vmem>>, %arg3: memref<32x32xf32, #tpu.memory_space<vmem>>, %arg4: memref<1x32xf32, #tpu.memory_space<vmem>>, %arg5: memref<32x32xf32, #tpu.memory_space<vmem>>, %arg6: memref<32x32xf32, #tpu.memory_space<vmem>>, %arg7: memref<32x32xf32, #tpu.memory_space<vmem>>, %arg8: memref<1x32xf32, #tpu.memory_space<vmem>>, %arg9: memref<64x32xf32, #tpu.memory_space<vmem>>, %arg10: memref<64x32xf32, #tpu.memory_space<vmem>>) attributes {dimension_semantics = [], scalar_prefetch = 0 : i64, scratch_operands = 1 : i64, tpu.core_type = #tpu.core_type<tc>} {
    %c0 = arith.constant 0 : index
    %c0_0 = arith.constant 0 : index
    %0 = vector.load %arg1[%c0, %c0_0] : memref<64x32xf32, #tpu.memory_space<vmem>>, vector<64x32xf32>
    %c0_1 = arith.constant 0 : index
    %c0_2 = arith.constant 0 : index
    %1 = vector.load %arg2[%c0_1, %c0_2] : memref<64x32xf32, #tpu.memory_space<vmem>>, vector<64x32xf32>
    %c0_3 = arith.constant 0 : index
    %c0_4 = arith.constant 0 : index
    %2 = vector.load %arg3[%c0_3, %c0_4] : memref<32x32xf32, #tpu.memory_space<vmem>>, vector<32x32xf32>
    %c0_5 = arith.constant 0 : index
    %c0_6 = arith.constant 0 : index
    %3 = vector.load %arg4[%c0_5, %c0_6] : memref<1x32xf32, #tpu.memory_space<vmem>>, vector<1x32xf32>
    %c0_7 = arith.constant 0 : index
    %c0_8 = arith.constant 0 : index
    %4 = vector.load %arg0[%c0_7, %c0_8] : memref<64x64xf32, #tpu.memory_space<vmem>>, vector<64x64xf32>
    %cst = arith.constant dense<0.000000e+00> : vector<64x32xf32>
    %5 = tpu.matmul %4, %0, %cst {dimension_numbers = #tpu.dot_dimension_numbers<[1], [0], [0], [1], [0, 0, 1, 1], [], []>} : vector<64x64xf32>, vector<64x32xf32>, vector<64x32xf32> -> vector<64x32xf32>
    %6 = vector.extract_strided_slice %4 {offsets = [56, 0], sizes = [8, 64], strides = [1, 1]} : vector<64x64xf32> to vector<8x64xf32>
    %7 = vector.extract_strided_slice %4 {offsets = [48, 0], sizes = [8, 64], strides = [1, 1]} : vector<64x64xf32> to vector<8x64xf32>
    %8 = vector.extract_strided_slice %4 {offsets = [40, 0], sizes = [8, 64], strides = [1, 1]} : vector<64x64xf32> to vector<8x64xf32>
    %9 = vector.extract_strided_slice %4 {offsets = [32, 0], sizes = [8, 64], strides = [1, 1]} : vector<64x64xf32> to vector<8x64xf32>
    %10 = vector.extract_strided_slice %4 {offsets = [24, 0], sizes = [8, 64], strides = [1, 1]} : vector<64x64xf32> to vector<8x64xf32>
    %11 = vector.extract_strided_slice %4 {offsets = [16, 0], sizes = [8, 64], strides = [1, 1]} : vector<64x64xf32> to vector<8x64xf32>
    %12 = vector.extract_strided_slice %4 {offsets = [8, 0], sizes = [8, 64], strides = [1, 1]} : vector<64x64xf32> to vector<8x64xf32>
    %13 = vector.extract_strided_slice %4 {offsets = [0, 0], sizes = [8, 64], strides = [1, 1]} : vector<64x64xf32> to vector<8x64xf32>
    %14 = tpu.concatenate %6, %7, %8, %9, %10, %11, %12, %13 in 0 : vector<8x64xf32>, vector<8x64xf32>, vector<8x64xf32>, vector<8x64xf32>, vector<8x64xf32>, vector<8x64xf32>, vector<8x64xf32>, vector<8x64xf32> -> vector<64x64xf32>
    %cst_9 = arith.constant dense<0.000000e+00> : vector<64x32xf32>
    %15 = tpu.matmul %14, %1, %cst_9 {dimension_numbers = #tpu.dot_dimension_numbers<[1], [0], [0], [1], [0, 0, 1, 1], [], []>} : vector<64x64xf32>, vector<64x32xf32>, vector<64x32xf32> -> vector<64x32xf32>
    %16 = arith.addf %5, %15 : vector<64x32xf32>
    %17 = vector.broadcast %3 : vector<1x32xf32> to vector<64x32xf32>
    %18 = arith.addf %16, %17 : vector<64x32xf32>
    %cst_10 = arith.constant 0.000000e+00 : f32
    %19 = vector.broadcast %cst_10 : f32 to vector<8x32xf32>
    %20 = vector.extract_strided_slice %18 {offsets = [0, 0], sizes = [8, 32], strides = [1, 1]} : vector<64x32xf32> to vector<8x32xf32>
    %cst_11 = arith.constant dense<0.000000e+00> : vector<8x32xf32>
    %21 = tpu.matmul %19, %2, %cst_11 {dimension_numbers = #tpu.dot_dimension_numbers<[1], [0], [0], [1], [0, 0, 1, 1], [], []>} : vector<8x32xf32>, vector<32x32xf32>, vector<8x32xf32> -> vector<8x32xf32>
    %22 = arith.addf %20, %21 : vector<8x32xf32>
    %23 = math.tanh %22 : vector<8x32xf32>
    %c0_12 = arith.constant 0 : index
    %c0_13 = arith.constant 0 : index
    %24 = vector.load %arg10[%c0_12, %c0_13] : memref<64x32xf32, #tpu.memory_space<vmem>>, vector<8x32xf32>
    tpu.vector_store %arg10[%c0_12, %c0_13], %23 {strides = array<i32>} : memref<64x32xf32, #tpu.memory_space<vmem>>, vector<8x32xf32>,
    %25 = vector.extract_strided_slice %18 {offsets = [8, 0], sizes = [8, 32], strides = [1, 1]} : vector<64x32xf32> to vector<8x32xf32>
    %cst_14 = arith.constant dense<0.000000e+00> : vector<8x32xf32>
    %26 = tpu.matmul %23, %2, %cst_14 {dimension_numbers = #tpu.dot_dimension_numbers<[1], [0], [0], [1], [0, 0, 1, 1], [], []>} : vector<8x32xf32>, vector<32x32xf32>, vector<8x32xf32> -> vector<8x32xf32>
    %27 = arith.addf %25, %26 : vector<8x32xf32>
    %28 = math.tanh %27 : vector<8x32xf32>
    %c8 = arith.constant 8 : index
    %c0_15 = arith.constant 0 : index
    %29 = vector.load %arg10[%c8, %c0_15] : memref<64x32xf32, #tpu.memory_space<vmem>>, vector<8x32xf32>
    tpu.vector_store %arg10[%c8, %c0_15], %28 {strides = array<i32>} : memref<64x32xf32, #tpu.memory_space<vmem>>, vector<8x32xf32>,
    %30 = vector.extract_strided_slice %18 {offsets = [16, 0], sizes = [8, 32], strides = [1, 1]} : vector<64x32xf32> to vector<8x32xf32>
    %cst_16 = arith.constant dense<0.000000e+00> : vector<8x32xf32>
    %31 = tpu.matmul %28, %2, %cst_16 {dimension_numbers = #tpu.dot_dimension_numbers<[1], [0], [0], [1], [0, 0, 1, 1], [], []>} : vector<8x32xf32>, vector<32x32xf32>, vector<8x32xf32> -> vector<8x32xf32>
    %32 = arith.addf %30, %31 : vector<8x32xf32>
    %33 = math.tanh %32 : vector<8x32xf32>
    %c16 = arith.constant 16 : index
    %c0_17 = arith.constant 0 : index
    %34 = vector.load %arg10[%c16, %c0_17] : memref<64x32xf32, #tpu.memory_space<vmem>>, vector<8x32xf32>
    tpu.vector_store %arg10[%c16, %c0_17], %33 {strides = array<i32>} : memref<64x32xf32, #tpu.memory_space<vmem>>, vector<8x32xf32>,
    %35 = vector.extract_strided_slice %18 {offsets = [24, 0], sizes = [8, 32], strides = [1, 1]} : vector<64x32xf32> to vector<8x32xf32>
    %cst_18 = arith.constant dense<0.000000e+00> : vector<8x32xf32>
    %36 = tpu.matmul %33, %2, %cst_18 {dimension_numbers = #tpu.dot_dimension_numbers<[1], [0], [0], [1], [0, 0, 1, 1], [], []>} : vector<8x32xf32>, vector<32x32xf32>, vector<8x32xf32> -> vector<8x32xf32>
    %37 = arith.addf %35, %36 : vector<8x32xf32>
    %38 = math.tanh %37 : vector<8x32xf32>
    %c24 = arith.constant 24 : index
    %c0_19 = arith.constant 0 : index
    %39 = vector.load %arg10[%c24, %c0_19] : memref<64x32xf32, #tpu.memory_space<vmem>>, vector<8x32xf32>
    tpu.vector_store %arg10[%c24, %c0_19], %38 {strides = array<i32>} : memref<64x32xf32, #tpu.memory_space<vmem>>, vector<8x32xf32>,
    %40 = vector.extract_strided_slice %18 {offsets = [32, 0], sizes = [8, 32], strides = [1, 1]} : vector<64x32xf32> to vector<8x32xf32>
    %cst_20 = arith.constant dense<0.000000e+00> : vector<8x32xf32>
    %41 = tpu.matmul %38, %2, %cst_20 {dimension_numbers = #tpu.dot_dimension_numbers<[1], [0], [0], [1], [0, 0, 1, 1], [], []>} : vector<8x32xf32>, vector<32x32xf32>, vector<8x32xf32> -> vector<8x32xf32>
    %42 = arith.addf %40, %41 : vector<8x32xf32>
    %43 = math.tanh %42 : vector<8x32xf32>
    %c32 = arith.constant 32 : index
    %c0_21 = arith.constant 0 : index
    %44 = vector.load %arg10[%c32, %c0_21] : memref<64x32xf32, #tpu.memory_space<vmem>>, vector<8x32xf32>
    tpu.vector_store %arg10[%c32, %c0_21], %43 {strides = array<i32>} : memref<64x32xf32, #tpu.memory_space<vmem>>, vector<8x32xf32>,
    %45 = vector.extract_strided_slice %18 {offsets = [40, 0], sizes = [8, 32], strides = [1, 1]} : vector<64x32xf32> to vector<8x32xf32>
    %cst_22 = arith.constant dense<0.000000e+00> : vector<8x32xf32>
    %46 = tpu.matmul %43, %2, %cst_22 {dimension_numbers = #tpu.dot_dimension_numbers<[1], [0], [0], [1], [0, 0, 1, 1], [], []>} : vector<8x32xf32>, vector<32x32xf32>, vector<8x32xf32> -> vector<8x32xf32>
    %47 = arith.addf %45, %46 : vector<8x32xf32>
    %48 = math.tanh %47 : vector<8x32xf32>
    %c40 = arith.constant 40 : index
    %c0_23 = arith.constant 0 : index
    %49 = vector.load %arg10[%c40, %c0_23] : memref<64x32xf32, #tpu.memory_space<vmem>>, vector<8x32xf32>
    tpu.vector_store %arg10[%c40, %c0_23], %48 {strides = array<i32>} : memref<64x32xf32, #tpu.memory_space<vmem>>, vector<8x32xf32>,
    %50 = vector.extract_strided_slice %18 {offsets = [48, 0], sizes = [8, 32], strides = [1, 1]} : vector<64x32xf32> to vector<8x32xf32>
    %cst_24 = arith.constant dense<0.000000e+00> : vector<8x32xf32>
    %51 = tpu.matmul %48, %2, %cst_24 {dimension_numbers = #tpu.dot_dimension_numbers<[1], [0], [0], [1], [0, 0, 1, 1], [], []>} : vector<8x32xf32>, vector<32x32xf32>, vector<8x32xf32> -> vector<8x32xf32>
    %52 = arith.addf %50, %51 : vector<8x32xf32>
    %53 = math.tanh %52 : vector<8x32xf32>
    %c48 = arith.constant 48 : index
    %c0_25 = arith.constant 0 : index
    %54 = vector.load %arg10[%c48, %c0_25] : memref<64x32xf32, #tpu.memory_space<vmem>>, vector<8x32xf32>
    tpu.vector_store %arg10[%c48, %c0_25], %53 {strides = array<i32>} : memref<64x32xf32, #tpu.memory_space<vmem>>, vector<8x32xf32>,
    %55 = vector.extract_strided_slice %18 {offsets = [56, 0], sizes = [8, 32], strides = [1, 1]} : vector<64x32xf32> to vector<8x32xf32>
    %cst_26 = arith.constant dense<0.000000e+00> : vector<8x32xf32>
    %56 = tpu.matmul %53, %2, %cst_26 {dimension_numbers = #tpu.dot_dimension_numbers<[1], [0], [0], [1], [0, 0, 1, 1], [], []>} : vector<8x32xf32>, vector<32x32xf32>, vector<8x32xf32> -> vector<8x32xf32>
    %57 = arith.addf %55, %56 : vector<8x32xf32>
    %58 = math.tanh %57 : vector<8x32xf32>
    %c56 = arith.constant 56 : index
    %c0_27 = arith.constant 0 : index
    %59 = vector.load %arg10[%c56, %c0_27] : memref<64x32xf32, #tpu.memory_space<vmem>>, vector<8x32xf32>
    tpu.vector_store %arg10[%c56, %c0_27], %58 {strides = array<i32>} : memref<64x32xf32, #tpu.memory_space<vmem>>, vector<8x32xf32>,
    %c0_28 = arith.constant 0 : index
    %c0_29 = arith.constant 0 : index
    %60 = vector.load %arg5[%c0_28, %c0_29] : memref<32x32xf32, #tpu.memory_space<vmem>>, vector<32x32xf32>
    %c0_30 = arith.constant 0 : index
    %c0_31 = arith.constant 0 : index
    %61 = vector.load %arg6[%c0_30, %c0_31] : memref<32x32xf32, #tpu.memory_space<vmem>>, vector<32x32xf32>
    %c0_32 = arith.constant 0 : index
    %c0_33 = arith.constant 0 : index
    %62 = vector.load %arg7[%c0_32, %c0_33] : memref<32x32xf32, #tpu.memory_space<vmem>>, vector<32x32xf32>
    %c0_34 = arith.constant 0 : index
    %c0_35 = arith.constant 0 : index
    %63 = vector.load %arg8[%c0_34, %c0_35] : memref<1x32xf32, #tpu.memory_space<vmem>>, vector<1x32xf32>
    %c0_36 = arith.constant 0 : index
    %c0_37 = arith.constant 0 : index
    %64 = vector.load %arg10[%c0_36, %c0_37] : memref<64x32xf32, #tpu.memory_space<vmem>>, vector<64x32xf32>
    %cst_38 = arith.constant dense<0.000000e+00> : vector<64x32xf32>
    %65 = tpu.matmul %64, %60, %cst_38 {dimension_numbers = #tpu.dot_dimension_numbers<[1], [0], [0], [1], [0, 0, 1, 1], [], []>} : vector<64x32xf32>, vector<32x32xf32>, vector<64x32xf32> -> vector<64x32xf32>
    %66 = vector.extract_strided_slice %64 {offsets = [56, 0], sizes = [8, 32], strides = [1, 1]} : vector<64x32xf32> to vector<8x32xf32>
    %67 = vector.extract_strided_slice %64 {offsets = [48, 0], sizes = [8, 32], strides = [1, 1]} : vector<64x32xf32> to vector<8x32xf32>
    %68 = vector.extract_strided_slice %64 {offsets = [40, 0], sizes = [8, 32], strides = [1, 1]} : vector<64x32xf32> to vector<8x32xf32>
    %69 = vector.extract_strided_slice %64 {offsets = [32, 0], sizes = [8, 32], strides = [1, 1]} : vector<64x32xf32> to vector<8x32xf32>
    %70 = vector.extract_strided_slice %64 {offsets = [24, 0], sizes = [8, 32], strides = [1, 1]} : vector<64x32xf32> to vector<8x32xf32>
    %71 = vector.extract_strided_slice %64 {offsets = [16, 0], sizes = [8, 32], strides = [1, 1]} : vector<64x32xf32> to vector<8x32xf32>
    %72 = vector.extract_strided_slice %64 {offsets = [8, 0], sizes = [8, 32], strides = [1, 1]} : vector<64x32xf32> to vector<8x32xf32>
    %73 = vector.extract_strided_slice %64 {offsets = [0, 0], sizes = [8, 32], strides = [1, 1]} : vector<64x32xf32> to vector<8x32xf32>
    %74 = tpu.concatenate %66, %67, %68, %69, %70, %71, %72, %73 in 0 : vector<8x32xf32>, vector<8x32xf32>, vector<8x32xf32>, vector<8x32xf32>, vector<8x32xf32>, vector<8x32xf32>, vector<8x32xf32>, vector<8x32xf32> -> vector<64x32xf32>
    %cst_39 = arith.constant dense<0.000000e+00> : vector<64x32xf32>
    %75 = tpu.matmul %74, %61, %cst_39 {dimension_numbers = #tpu.dot_dimension_numbers<[1], [0], [0], [1], [0, 0, 1, 1], [], []>} : vector<64x32xf32>, vector<32x32xf32>, vector<64x32xf32> -> vector<64x32xf32>
    %76 = arith.addf %65, %75 : vector<64x32xf32>
    %77 = vector.broadcast %63 : vector<1x32xf32> to vector<64x32xf32>
    %78 = arith.addf %76, %77 : vector<64x32xf32>
    %cst_40 = arith.constant 0.000000e+00 : f32
    %79 = vector.broadcast %cst_40 : f32 to vector<8x32xf32>
    %80 = vector.extract_strided_slice %78 {offsets = [0, 0], sizes = [8, 32], strides = [1, 1]} : vector<64x32xf32> to vector<8x32xf32>
    %cst_41 = arith.constant dense<0.000000e+00> : vector<8x32xf32>
    %81 = tpu.matmul %79, %62, %cst_41 {dimension_numbers = #tpu.dot_dimension_numbers<[1], [0], [0], [1], [0, 0, 1, 1], [], []>} : vector<8x32xf32>, vector<32x32xf32>, vector<8x32xf32> -> vector<8x32xf32>
    %82 = arith.addf %80, %81 : vector<8x32xf32>
    %83 = math.tanh %82 : vector<8x32xf32>
    %c0_42 = arith.constant 0 : index
    %c0_43 = arith.constant 0 : index
    %84 = vector.load %arg10[%c0_42, %c0_43] : memref<64x32xf32, #tpu.memory_space<vmem>>, vector<8x32xf32>
    tpu.vector_store %arg10[%c0_42, %c0_43], %83 {strides = array<i32>} : memref<64x32xf32, #tpu.memory_space<vmem>>, vector<8x32xf32>,
    %85 = vector.extract_strided_slice %78 {offsets = [8, 0], sizes = [8, 32], strides = [1, 1]} : vector<64x32xf32> to vector<8x32xf32>
    %cst_44 = arith.constant dense<0.000000e+00> : vector<8x32xf32>
    %86 = tpu.matmul %83, %62, %cst_44 {dimension_numbers = #tpu.dot_dimension_numbers<[1], [0], [0], [1], [0, 0, 1, 1], [], []>} : vector<8x32xf32>, vector<32x32xf32>, vector<8x32xf32> -> vector<8x32xf32>
    %87 = arith.addf %85, %86 : vector<8x32xf32>
    %88 = math.tanh %87 : vector<8x32xf32>
    %c8_45 = arith.constant 8 : index
    %c0_46 = arith.constant 0 : index
    %89 = vector.load %arg10[%c8_45, %c0_46] : memref<64x32xf32, #tpu.memory_space<vmem>>, vector<8x32xf32>
    tpu.vector_store %arg10[%c8_45, %c0_46], %88 {strides = array<i32>} : memref<64x32xf32, #tpu.memory_space<vmem>>, vector<8x32xf32>,
    %90 = vector.extract_strided_slice %78 {offsets = [16, 0], sizes = [8, 32], strides = [1, 1]} : vector<64x32xf32> to vector<8x32xf32>
    %cst_47 = arith.constant dense<0.000000e+00> : vector<8x32xf32>
    %91 = tpu.matmul %88, %62, %cst_47 {dimension_numbers = #tpu.dot_dimension_numbers<[1], [0], [0], [1], [0, 0, 1, 1], [], []>} : vector<8x32xf32>, vector<32x32xf32>, vector<8x32xf32> -> vector<8x32xf32>
    %92 = arith.addf %90, %91 : vector<8x32xf32>
    %93 = math.tanh %92 : vector<8x32xf32>
    %c16_48 = arith.constant 16 : index
    %c0_49 = arith.constant 0 : index
    %94 = vector.load %arg10[%c16_48, %c0_49] : memref<64x32xf32, #tpu.memory_space<vmem>>, vector<8x32xf32>
    tpu.vector_store %arg10[%c16_48, %c0_49], %93 {strides = array<i32>} : memref<64x32xf32, #tpu.memory_space<vmem>>, vector<8x32xf32>,
    %95 = vector.extract_strided_slice %78 {offsets = [24, 0], sizes = [8, 32], strides = [1, 1]} : vector<64x32xf32> to vector<8x32xf32>
    %cst_50 = arith.constant dense<0.000000e+00> : vector<8x32xf32>
    %96 = tpu.matmul %93, %62, %cst_50 {dimension_numbers = #tpu.dot_dimension_numbers<[1], [0], [0], [1], [0, 0, 1, 1], [], []>} : vector<8x32xf32>, vector<32x32xf32>, vector<8x32xf32> -> vector<8x32xf32>
    %97 = arith.addf %95, %96 : vector<8x32xf32>
    %98 = math.tanh %97 : vector<8x32xf32>
    %c24_51 = arith.constant 24 : index
    %c0_52 = arith.constant 0 : index
    %99 = vector.load %arg10[%c24_51, %c0_52] : memref<64x32xf32, #tpu.memory_space<vmem>>, vector<8x32xf32>
    tpu.vector_store %arg10[%c24_51, %c0_52], %98 {strides = array<i32>} : memref<64x32xf32, #tpu.memory_space<vmem>>, vector<8x32xf32>,
    %100 = vector.extract_strided_slice %78 {offsets = [32, 0], sizes = [8, 32], strides = [1, 1]} : vector<64x32xf32> to vector<8x32xf32>
    %cst_53 = arith.constant dense<0.000000e+00> : vector<8x32xf32>
    %101 = tpu.matmul %98, %62, %cst_53 {dimension_numbers = #tpu.dot_dimension_numbers<[1], [0], [0], [1], [0, 0, 1, 1], [], []>} : vector<8x32xf32>, vector<32x32xf32>, vector<8x32xf32> -> vector<8x32xf32>
    %102 = arith.addf %100, %101 : vector<8x32xf32>
    %103 = math.tanh %102 : vector<8x32xf32>
    %c32_54 = arith.constant 32 : index
    %c0_55 = arith.constant 0 : index
    %104 = vector.load %arg10[%c32_54, %c0_55] : memref<64x32xf32, #tpu.memory_space<vmem>>, vector<8x32xf32>
    tpu.vector_store %arg10[%c32_54, %c0_55], %103 {strides = array<i32>} : memref<64x32xf32, #tpu.memory_space<vmem>>, vector<8x32xf32>,
    %105 = vector.extract_strided_slice %78 {offsets = [40, 0], sizes = [8, 32], strides = [1, 1]} : vector<64x32xf32> to vector<8x32xf32>
    %cst_56 = arith.constant dense<0.000000e+00> : vector<8x32xf32>
    %106 = tpu.matmul %103, %62, %cst_56 {dimension_numbers = #tpu.dot_dimension_numbers<[1], [0], [0], [1], [0, 0, 1, 1], [], []>} : vector<8x32xf32>, vector<32x32xf32>, vector<8x32xf32> -> vector<8x32xf32>
    %107 = arith.addf %105, %106 : vector<8x32xf32>
    %108 = math.tanh %107 : vector<8x32xf32>
    %c40_57 = arith.constant 40 : index
    %c0_58 = arith.constant 0 : index
    %109 = vector.load %arg10[%c40_57, %c0_58] : memref<64x32xf32, #tpu.memory_space<vmem>>, vector<8x32xf32>
    tpu.vector_store %arg10[%c40_57, %c0_58], %108 {strides = array<i32>} : memref<64x32xf32, #tpu.memory_space<vmem>>, vector<8x32xf32>,
    %110 = vector.extract_strided_slice %78 {offsets = [48, 0], sizes = [8, 32], strides = [1, 1]} : vector<64x32xf32> to vector<8x32xf32>
    %cst_59 = arith.constant dense<0.000000e+00> : vector<8x32xf32>
    %111 = tpu.matmul %108, %62, %cst_59 {dimension_numbers = #tpu.dot_dimension_numbers<[1], [0], [0], [1], [0, 0, 1, 1], [], []>} : vector<8x32xf32>, vector<32x32xf32>, vector<8x32xf32> -> vector<8x32xf32>
    %112 = arith.addf %110, %111 : vector<8x32xf32>
    %113 = math.tanh %112 : vector<8x32xf32>
    %c48_60 = arith.constant 48 : index
    %c0_61 = arith.constant 0 : index
    %114 = vector.load %arg10[%c48_60, %c0_61] : memref<64x32xf32, #tpu.memory_space<vmem>>, vector<8x32xf32>
    tpu.vector_store %arg10[%c48_60, %c0_61], %113 {strides = array<i32>} : memref<64x32xf32, #tpu.memory_space<vmem>>, vector<8x32xf32>,
    %115 = vector.extract_strided_slice %78 {offsets = [56, 0], sizes = [8, 32], strides = [1, 1]} : vector<64x32xf32> to vector<8x32xf32>
    %cst_62 = arith.constant dense<0.000000e+00> : vector<8x32xf32>
    %116 = tpu.matmul %113, %62, %cst_62 {dimension_numbers = #tpu.dot_dimension_numbers<[1], [0], [0], [1], [0, 0, 1, 1], [], []>} : vector<8x32xf32>, vector<32x32xf32>, vector<8x32xf32> -> vector<8x32xf32>
    %117 = arith.addf %115, %116 : vector<8x32xf32>
    %118 = math.tanh %117 : vector<8x32xf32>
    %c56_63 = arith.constant 56 : index
    %c0_64 = arith.constant 0 : index
    %119 = vector.load %arg10[%c56_63, %c0_64] : memref<64x32xf32, #tpu.memory_space<vmem>>, vector<8x32xf32>
    tpu.vector_store %arg10[%c56_63, %c0_64], %118 {strides = array<i32>} : memref<64x32xf32, #tpu.memory_space<vmem>>, vector<8x32xf32>,
    %c0_65 = arith.constant 0 : index
    %c0_66 = arith.constant 0 : index
    %120 = vector.load %arg10[%c0_65, %c0_66] : memref<64x32xf32, #tpu.memory_space<vmem>>, vector<64x16xf32>
    %c0_67 = arith.constant 0 : index
    %c0_68 = arith.constant 0 : index
    %121 = vector.load %arg9[%c0_67, %c0_68] : memref<64x32xf32, #tpu.memory_space<vmem>>, vector<64x16xf32>
    tpu.vector_store %arg9[%c0_67, %c0_68], %120 {strides = array<i32>} : memref<64x32xf32, #tpu.memory_space<vmem>>, vector<64x16xf32>,
    %c0_69 = arith.constant 0 : index
    %c16_70 = arith.constant 16 : index
    %122 = vector.load %arg10[%c0_69, %c16_70] : memref<64x32xf32, #tpu.memory_space<vmem>>, vector<64x16xf32>
    %123 = vector.extract_strided_slice %122 {offsets = [56, 0], sizes = [8, 16], strides = [1, 1]} : vector<64x16xf32> to vector<8x16xf32>
    %124 = vector.extract_strided_slice %122 {offsets = [48, 0], sizes = [8, 16], strides = [1, 1]} : vector<64x16xf32> to vector<8x16xf32>
    %125 = vector.extract_strided_slice %122 {offsets = [40, 0], sizes = [8, 16], strides = [1, 1]} : vector<64x16xf32> to vector<8x16xf32>
    %126 = vector.extract_strided_slice %122 {offsets = [32, 0], sizes = [8, 16], strides = [1, 1]} : vector<64x16xf32> to vector<8x16xf32>
    %127 = vector.extract_strided_slice %122 {offsets = [24, 0], sizes = [8, 16], strides = [1, 1]} : vector<64x16xf32> to vector<8x16xf32>
    %128 = vector.extract_strided_slice %122 {offsets = [16, 0], sizes = [8, 16], strides = [1, 1]} : vector<64x16xf32> to vector<8x16xf32>
    %129 = vector.extract_strided_slice %122 {offsets = [8, 0], sizes = [8, 16], strides = [1, 1]} : vector<64x16xf32> to vector<8x16xf32>
    %130 = vector.extract_strided_slice %122 {offsets = [0, 0], sizes = [8, 16], strides = [1, 1]} : vector<64x16xf32> to vector<8x16xf32>
    %131 = tpu.concatenate %123, %124, %125, %126, %127, %128, %129, %130 in 0 : vector<8x16xf32>, vector<8x16xf32>, vector<8x16xf32>, vector<8x16xf32>, vector<8x16xf32>, vector<8x16xf32>, vector<8x16xf32>, vector<8x16xf32> -> vector<64x16xf32>
    %c0_71 = arith.constant 0 : index
    %c16_72 = arith.constant 16 : index
    %132 = vector.load %arg9[%c0_71, %c16_72] : memref<64x32xf32, #tpu.memory_space<vmem>>, vector<64x16xf32>
    tpu.vector_store %arg9[%c0_71, %c16_72], %131 {strides = array<i32>} : memref<64x32xf32, #tpu.memory_space<vmem>>, vector<64x16xf32>,
    return
  }
}

</mosaic_0001>

<bundles_post_ra>
// kernel: tpu_custom_call.1
= control target key start
LH: loop header
LB: loop body
LE: loop exit
PB: predicated region body
PF: predicated region fallthrough
CT: control target
= control target key end

     0   :  { %14 = vsyncpa [#allocation4], 0  ;;  %s2524_s30 = smov [#allocation3]   ;;  %s2968_s0 = inlined_call_operand.vmem [shape: f32[64,64], index: 0, kind: input, shape index: {}]   ;;  %s2969_s1 = inlined_call_operand.vmem [shape: f32[64,32], index: 1, kind: input, shape index: {}]   ;;  %s2970_s2 = inlined_call_operand.vmem [shape: f32[64,32], index: 2, kind: input, shape index: {}]   ;;  %s2971_s3 = inlined_call_operand.vmem [shape: f32[32,32], index: 3, kind: input, shape index: {}]   ;;  %s2972_s4 = inlined_call_operand.vmem [shape: f32[1,32], index: 4, kind: input, shape index: {}]   ;;  %s2973_s5 = inlined_call_operand.vmem [shape: f32[32,32], index: 5, kind: input, shape index: {}]   ;;  %s2974_s6 = inlined_call_operand.vmem [shape: f32[32,32], index: 6, kind: input, shape index: {}]   ;;  %s2975_s7 = inlined_call_operand.hbm [shape: f32[32,32], index: 7, kind: input, shape index: {}]   ;;  %s2976_s8 = inlined_call_operand.vmem [shape: f32[1,32], index: 8, kind: input, shape index: {}]   ;;  %s2977_s9 = inlined_call_operand.vmem [shape: f32[64,32], index: 9, kind: output, shape index: {}]  }
   0x1   :  { %s34_s10 = sshll.u32 %s2524_s30, 4  ;;  %s2500_s13 = scalar_lea.hbm %s2975_s7, 512  ;;  %s35_s10 = int_to_ptr.vmem [resolvable:$true] %s34_s10 }
   0x2   :  { %p2501_p0 = scmp.ne.s32.totalorder %s2975_s7, %s2500_s13  ;;  %p2504_p1 = scmp.lt.u32.totalorder %s2500_s13, %s2975_s7 }
   0x4   :  { %p2506_p2 = pnand %p2504_p1, %p2501_p0 }
   0x6   :  { %2509 = shalt.err (!%p2506_p2)
}
   0x7   :  { %s2510_s18 = scalar_lea.vmem %s35_s10, 512  ;;  %p2515_p4 = scmp.lt.s32.totalorder %s35_s10, %s35_s10 }
   0x8   :  { %p2511_p3 = scmp.ne.s32.totalorder %s35_s10, %s2510_s18  ;;  %p2516_p5 = scmp.lt.s32.totalorder %s2510_s18, %s2510_s18 }
   0xa   :  { %p2517_p6 = por %p2516_p5, %p2515_p4 }
   0xc   :  { %p2518_p7 = pnand %p2517_p6, %p2511_p3 }
   0xe   :  { %2521 = shalt.err (!%p2518_p7)
}
   0xf   :  { %s2525_s19 = smov 128   ;;  %s2526_s20 = smov 8  }
  0x10   :  { %40 = dma.hbm_to_vmem [thread:$0]  %s2975_s7, 512, %s35_s10, [#allocation4], %s2525_s19, %s2525_s19, %s2526_s20  }
  0x11   :  { %2522 = dma.done.wait [#allocation4], 512  }
  0x12   :  { %2523 = vsyncadd [#allocation4], 4294966784  ;;  %v2527_v0 = vmov 0.0|0.0   ;;  %vm2528_vm0 = vmmov 0   ;;  %v2529_v1 = vmov 0.0   ;;  %v54_v2 = vld [vmem:[%s2970_s2] sm:$0xff] }
  0x13   :  { %2334 = vmatprep.subr.bf16.mxu1 %v2527_v0  ;;  %2094 = vmatprep.mubr.msk.f32.mxu1 %vm2528_vm0, %v2529_v1  ;;  %v55_v3 = vld [vmem:[%s2970_s2 + $0x8] sm:$0xff]  ;;  %v56_v4 = vld [vmem:[%s2970_s2 + $0x10] sm:$0xff]  ;;  %vm75_vm1 = vcmask 523264   ;;  %v57_v6 = vld [vmem:[%s2970_s2 + $0x18] sm:$0xff]  ;;  %vm324_vm2 = vcmask 261120   ;;  %vm1815_vm3 = vcmask 130048  }
  0x14   :  { %v2302_v5 = vpack.c.bf16 %v55_v3, %v54_v2  ;;  %v2306_v7 = vpack.c.bf16 %v57_v6, %v56_v4  ;;  %v58_v8 = vld [vmem:[%s2970_s2 + $0x20] sm:$0xff]  ;;  %v59_v9 = vld [vmem:[%s2970_s2 + $0x28] sm:$0xff]  ;;  %v2616_v10 = vld [vmem:[%s2968_s0 + $0x38] sm:$0xff]  ;;  %vm1832_vm4 = vcmask 261248  }
  0x15   :  { %2046 = vmatprep.mubr.msk.f32.mxu0 %vm75_vm1, %v2616_v10  ;;  %v2310_v11 = vpack.c.bf16 %v59_v9, %v58_v8  ;;  %v60_v12 = vld [vmem:[%s2970_s2 + $0x30] sm:$0xff]  ;;  %v61_v13 = vld [vmem:[%s2970_s2 + $0x38] sm:$0xff]  ;;  %v62_v14 = vld [vmem:[%s2971_s3] sm:$0xff] }
  0x16   :  { %2303 = vmatprep.subr.bf16.mxu0 %v2302_v5  ;;  %v63_v15 = vld [vmem:[%s2971_s3 + $0x8] sm:$0xff]  ;;  %v64_v16 = vld [vmem:[%s2971_s3 + $0x10] sm:$0xff]  ;;  %v2314_v17 = vpack.c.bf16 %v61_v13, %v60_v12  ;;  %v65_v19 = vld [vmem:[%s2971_s3 + $0x18] sm:$0xff] }
  0x17   :  { %2305 = vmatpush3.bf16.msra.mxu0 %v2302_v5  ;;  %v2635_v18 = vpack.c.bf16 %v63_v15, %v62_v14  ;;  %v46_v20 = vld [vmem:[%s2969_s1] sm:$0xff]  ;;  %v47_v21 = vld [vmem:[%s2969_s1 + $0x8] sm:$0xff]  ;;  %v2647_v22 = vpack.c.bf16 %v65_v19, %v64_v16  ;;  %v48_v24 = vld [vmem:[%s2969_s1 + $0x10] sm:$0xff] }
  0x18   :  { %2307 = vmatprep.subr.bf16.mxu0 %v2306_v7  ;;  %v2318_v23 = vpack.c.bf16 %v47_v21, %v46_v20  ;;  %v49_v25 = vld [vmem:[%s2969_s1 + $0x18] sm:$0xff]  ;;  %v73_v26 = vld [vmem:[%s2968_s0 + $0x30] sm:$0xff]  ;;  %v72_v27 = vld [vmem:[%s2968_s0 + $0x28] sm:$0xff] }
  0x19   :  { %2336 = vmatpush3.bf16.msra.mxu1 %v2635_v18  ;;  %v2322_v28 = vpack.c.bf16 %v49_v25, %v48_v24  ;;  %v50_v29 = vld [vmem:[%s2969_s1 + $0x20] sm:$0xff]  ;;  %v51_v30 = vld [vmem:[%s2969_s1 + $0x28] sm:$0xff]  ;;  %v70_v32 = vld [vmem:[%s2968_s0 + $0x18] sm:$0xff] }
  0x1a   :  { %2337 = vmatprep.subr.bf16.mxu1 %v2527_v0  ;;  %v71_v31 = vld [vmem:[%s2968_s0 + $0x20] sm:$0xff]  ;;  %v2326_v33 = vpack.c.bf16 %v51_v30, %v50_v29  ;;  %v52_v34 = vld [vmem:[%s2969_s1 + $0x30] sm:$0xff]  ;;  %v53_v35 = vld [vmem:[%s2969_s1 + $0x38] sm:$0xff] }
  0x1b   :  { %2309 = vmatpush3.bf16.msra.mxu0 %v2306_v7  ;;  %v69_v36 = vld [vmem:[%s2968_s0 + $0x10] sm:$0xff]  ;;  %v68_v37 = vld [vmem:[%s2968_s0 + $0x8] sm:$0xff]  ;;  %v2330_v38 = vpack.c.bf16 %v53_v35, %v52_v34  ;;  %v67_v39 = vld [vmem:[%s2968_s0] sm:$0xff] }
  0x1c   :  { %2311 = vmatprep.subr.bf16.mxu0 %v2310_v11  ;;  %v1862_v42 = vld [vmem:[%s2972_s4] ss:$0 sm:$0xff]  ;;  %v938_v24 = vld [vmem:[%s2974_s6 + $0x8] sm:$0xff]  ;;  %v943_v35 = vld [vmem:[#allocation3 + $0x10] sm:$0xff] }
  0x1d   :  { %2339 = vmatpush3.bf16.msra.mxu1 %v2647_v22  ;;  %v933_v29 = vld [vmem:[%s2973_s5] sm:$0xff]  ;;  %v934_v30 = vld [vmem:[%s2973_s5 + $0x8] sm:$0xff] }
  0x1e   :  { %2340 = vmatprep.subr.bf16.mxu1 %v2527_v0 }
  0x1f   :  { %2313 = vmatpush3.bf16.msra.mxu0 %v2310_v11 }
  0x20   :  { %2315 = vmatprep.subr.bf16.mxu0 %v2314_v17  ;;  %2095 = vmatmul.mubr.f32.vlgmr.msra.gmra.mrb[0].mxu1 %v2529_v1 }
  0x21   :  { %2342 = vmatpush3.bf16.msra.mxu1 %v2635_v18  ;;  %2105 = vmatprep.mubr.msk.f32.mxu1 %vm2528_vm0, %v2529_v1 }
  0x22   :  { %2343 = vmatprep.subr.bf16.mxu1 %v2527_v0 }
  0x23   :  { %2317 = vmatpush3.bf16.msra.mxu0 %v2314_v17 }
  0x24   :  { %2319 = vmatprep.subr.bf16.mxu0 %v2318_v23 }
  0x25   :  { %2345 = vmatpush3.bf16.msra.mxu1 %v2647_v22 }
  0x26   :  { %2047 = vmatmul.mubr.msk.f32.vlgmr.msra.gmra.mrb[0].mxu0 %vm75_vm1, %v73_v26  ;;  %2346 = vmatprep.subr.bf16.mxu1 %v2527_v0 }
  0x27   :  { %2321 = vmatpush3.bf16.msra.mxu0 %v2318_v23  ;;  %2049 = vmatprep.mubr.msk.f32.mxu0 %vm75_vm1, %v72_v27 }
  0x28   :  { %2323 = vmatprep.subr.bf16.mxu0 %v2322_v28 }
  0x2a   :  { %2050 = vmatmul.mubr.msk.f32.gmra.mrb[2].mxu0 %vm75_vm1, %v71_v31 }
  0x2b   :  { %2325 = vmatpush3.bf16.msra.mxu0 %v2322_v28  ;;  %2052 = vmatprep.mubr.msk.f32.mxu0 %vm75_vm1, %v70_v32 }
  0x2c   :  { %2327 = vmatprep.subr.bf16.mxu0 %v2326_v33 }
  0x2e   :  { %2053 = vmatmul.mubr.msk.f32.gmra.mrb[4].mxu0 %vm75_vm1, %v69_v36 }
  0x2f   :  { %2329 = vmatpush3.bf16.msra.mxu0 %v2326_v33  ;;  %2055 = vmatprep.mubr.msk.f32.mxu0 %vm75_vm1, %v68_v37  ;;  %v942_v33 = vld [vmem:[#allocation3 + $0x8] sm:$0xff] }
  0x30   :  { %2331 = vmatprep.subr.bf16.mxu0 %v2330_v38 }
  0x32   :  { %2056 = vmatmul.mubr.msk.f32.gmra.mrb[6].mxu0 %vm75_vm1, %v67_v39 }
  0x33   :  { %2333 = vmatpush3.bf16.msra.mxu0 %v2330_v38  ;;  %2074 = vmatprep.mubr.msk.f32.mxu0 %vm75_vm1, %v67_v39 }
  0x34   :  { %2364 = vmatprep.subr.bf16.mxu0 %v2527_v0 }
  0x36   :  { %2075 = vmatmul.mubr.msk.f32.vlgmr.msra.gmra.mrb[0].mxu0 %vm75_vm1, %v68_v37 }
  0x37   :  { %2077 = vmatprep.mubr.msk.f32.mxu0 %vm75_vm1, %v69_v36  ;;  %2366 = vmatpush3.bf16.msra.mxu0 %v2635_v18  ;;  %v944_v36 = vld [vmem:[#allocation3 + $0x18] sm:$0xff] }
  0x38   :  { %2367 = vmatprep.subr.bf16.mxu0 %v2527_v0  ;;  %v2799_v37 = vpack.c.bf16 %v944_v36, %v943_v35 }
  0x3a   :  { %2078 = vmatmul.mubr.msk.f32.gmra.mrb[2].mxu0 %vm75_vm1, %v70_v32  ;;  %v941_v32 = vld [vmem:[#allocation3] sm:$0xff] }
  0x3b   :  { %2080 = vmatprep.mubr.msk.f32.mxu0 %vm75_vm1, %v71_v31  ;;  %2369 = vmatpush3.bf16.msra.mxu0 %v2647_v22  ;;  %v2390_v31 = vpack.c.bf16 %v934_v30, %v933_v29  ;;  %v2795_v34 = vpack.c.bf16 %v942_v33, %v941_v32 }
  0x3c   :  { %2376 = vmatprep.subr.bf16.mxu0 %v2527_v0 }
  0x3e   :  { %2081 = vmatmul.mubr.msk.f32.gmra.mrb[4].mxu0 %vm75_vm1, %v72_v27  ;;  %v940_v27 = vld [vmem:[%s2974_s6 + $0x18] sm:$0xff] }
  0x3f   :  { %2083 = vmatprep.mubr.msk.f32.mxu0 %vm75_vm1, %v73_v26  ;;  %v939_v26 = vld [vmem:[%s2974_s6 + $0x10] sm:$0xff] }
  0x40   :  { %v2386_v28 = vpack.c.bf16 %v940_v27, %v939_v26 }
  0x42   :  { %2084 = vmatmul.mubr.msk.f32.gmra.mrb[6].mxu0 %vm75_vm1, %v2616_v10 }
  0x43   :  { %2149 = vmatprep.mubr.msk.f32.mxu0 %vm2528_vm0, %v2529_v1 }
  0xf3   :  { %v394_v40 = vpop.f32.mrb[0].mxu1 }
  0xf4   :  { %v2096_v41 = vpop.f32.mrb[1].mxu1 }
 0x109   :  { %v2076_v43 = vpop.f32.mrb[0].mxu0 }
 0x10a   :  { %v317_v44 = vadd.f32 %v2076_v43, %v1862_v42  ;;  %v271_v45 = vpop.f32.mrb[1].mxu0  ;;  %v936_v43 = vld [vmem:[%s2973_s5 + $0x18] sm:$0xff] }
 0x10b   :  { %v316_v46 = vadd.f32 %v1862_v42, %v271_v45 }
 0x10d   :  { %v398_v47 = vadd.f32 %v394_v40, %v316_v46  ;;  %v2079_v48 = vpop.f32.mrb[2].mxu0 }
 0x10e   :  { %v319_v49 = vadd.f32 %v2079_v48, %v1862_v42  ;;  %v281_v50 = vpop.f32.mrb[3].mxu0 }
 0x10f   :  { %2468 = vtanh.f32 %v398_v47  ;;  %v318_v51 = vadd.f32 %v1862_v42, %v281_v50 }
 0x111   :  { %v2082_v52 = vpop.f32.mrb[4].mxu0 }
 0x112   :  { %v2724_v53 = vadd.f32 %v2082_v52, %v1862_v42  ;;  %v291_v54 = vpop.f32.mrb[5].mxu0 }
 0x113   :  { %v320_v55 = vadd.f32 %v1862_v42, %v291_v54 }
 0x115   :  { %v2085_v56 = vpop.f32.mrb[6].mxu0 }
 0x116   :  { %v2726_v57 = vadd.f32 %v2085_v56, %v1862_v42  ;;  %v301_v58 = vpop.f32.mrb[7].mxu0 }
 0x117   :  { %v2728_v59 = vadd.f32 %v1862_v42, %v301_v58  ;;  %v935_v42 = vld [vmem:[%s2973_s5 + $0x10] sm:$0xff] }
 0x118   :  { %v2394_v45 = vpack.c.bf16 %v936_v43, %v935_v42 }
 0x119   :  { %v2469_v60 = vpop.eup %2468 }
 0x11a   :  { %400 = vst.msk [vmem:[#allocation2] sm:$0xff] %vm324_vm2, %v2469_v60  ;;  %2106 = vmatmul.mubr.msk.f32.vlgmr.msra.gmra.mrb[2].mxu1 %vm324_vm2, %v2469_v60 }
 0x11b   :  { %2348 = vmatpush3.bf16.msra.mxu1 %v2635_v18  ;;  %2116 = vmatprep.mubr.msk.f32.mxu1 %vm2528_vm0, %v2529_v1 }
 0x11c   :  { %2349 = vmatprep.subr.bf16.mxu1 %v2527_v0 }
 0x11f   :  { %2351 = vmatpush3.bf16.msra.mxu1 %v2647_v22 }
 0x120   :  { %2352 = vmatprep.subr.bf16.mxu1 %v2527_v0 }
 0x121   :  { %v946_v52 = vld [vmem:[#allocation2] sm:$0xff] }
 0x1ed   :  { %v470_v61 = vpop.f32.mrb[2].mxu1 }
 0x1ee   :  { %v474_v62 = vadd.f32 %v470_v61, %v317_v44  ;;  %v2107_v63 = vpop.f32.mrb[3].mxu1 }
 0x1f0   :  { %2470 = vtanh.f32 %v474_v62 }
 0x1fa   :  { %v2471_v2 = vpop.eup %2470 }
 0x1fb   :  { %476 = vst.msk [vmem:[#allocation2 + $0x8] sm:$0xff] %vm324_vm2, %v2471_v2  ;;  %2117 = vmatmul.mubr.msk.f32.vlgmr.msra.gmra.mrb[4].mxu1 %vm324_vm2, %v2471_v2 }
 0x1fc   :  { %2354 = vmatpush3.bf16.msra.mxu1 %v2635_v18  ;;  %2127 = vmatprep.mubr.msk.f32.mxu1 %vm2528_vm0, %v2529_v1 }
 0x1fd   :  { %2355 = vmatprep.subr.bf16.mxu1 %v2527_v0 }
 0x200   :  { %2357 = vmatpush3.bf16.msra.mxu1 %v2647_v22 }
 0x201   :  { %2358 = vmatprep.subr.bf16.mxu1 %v2527_v0 }
 0x2ce   :  { %v546_v3 = vpop.f32.mrb[4].mxu1 }
 0x2cf   :  { %v550_v4 = vadd.f32 %v546_v3, %v318_v51  ;;  %v2118_v5 = vpop.f32.mrb[5].mxu1  ;;  %v947_v51 = vld [vmem:[#allocation2 + $0x8] sm:$0xff] }
 0x2d1   :  { %2472 = vtanh.f32 %v550_v4 }
 0x2db   :  { %v2473_v6 = vpop.eup %2472 }
 0x2dc   :  { %552 = vst.msk [vmem:[#allocation2 + $0x10] sm:$0xff] %vm324_vm2, %v2473_v6  ;;  %2128 = vmatmul.mubr.msk.f32.vlgmr.msra.gmra.mrb[6].mxu1 %vm324_vm2, %v2473_v6 }
 0x2dd   :  { %2360 = vmatpush3.bf16.msra.mxu1 %v2635_v18  ;;  %2138 = vmatprep.mubr.msk.f32.mxu1 %vm2528_vm0, %v2529_v1 }
 0x2de   :  { %2361 = vmatprep.subr.bf16.mxu1 %v2527_v0 }
 0x2e1   :  { %2363 = vmatpush3.bf16.msra.mxu1 %v2647_v22 }
 0x2e2   :  { %2370 = vmatprep.subr.bf16.mxu1 %v2527_v0 }
 0x2e3   :  { %v948_v50 = vld [vmem:[#allocation2 + $0x10] sm:$0xff] }
 0x3af   :  { %v622_v7 = vpop.f32.mrb[6].mxu1 }
 0x3b0   :  { %v626_v8 = vadd.f32 %v622_v7, %v319_v49  ;;  %v2129_v9 = vpop.f32.mrb[7].mxu1 }
 0x3b2   :  { %2474 = vtanh.f32 %v626_v8 }
 0x3bc   :  { %v2475_v10 = vpop.eup %2474 }
 0x3bd   :  { %628 = vst.msk [vmem:[#allocation2 + $0x18] sm:$0xff] %vm324_vm2, %v2475_v10  ;;  %2139 = vmatmul.mubr.msk.f32.vlgmr.msra.gmra.mrb[8].mxu1 %vm324_vm2, %v2475_v10 }
 0x3be   :  { %2372 = vmatpush3.bf16.msra.mxu1 %v2635_v18  ;;  %2160 = vmatprep.mubr.msk.f32.mxu1 %vm2528_vm0, %v2529_v1 }
 0x3bf   :  { %2373 = vmatprep.subr.bf16.mxu1 %v2527_v0 }
 0x3c2   :  { %2375 = vmatpush3.bf16.msra.mxu1 %v2647_v22 }
 0x3c4   :  { %v949_v49 = vld [vmem:[#allocation2 + $0x18] sm:$0xff] }
 0x490   :  { %v698_v11 = vpop.f32.mrb[8].mxu1 }
 0x491   :  { %v702_v12 = vadd.f32 %v698_v11, %v320_v55  ;;  %v2140_v13 = vpop.f32.mrb[9].mxu1  ;;  %v1886_v55 = vld [vmem:[%s2976_s8] ss:$0 sm:$0xff] }
 0x493   :  { %2476 = vtanh.f32 %v702_v12 }
 0x49d   :  { %v2477_v14 = vpop.eup %2476 }
 0x49e   :  { %704 = vst.msk [vmem:[#allocation2 + $0x20] sm:$0xff] %vm324_vm2, %v2477_v14  ;;  %2150 = vmatmul.mubr.msk.f32.vlgmr.msra.gmra.mrb[8].mxu0 %vm324_vm2, %v2477_v14 }
 0x49f   :  { %2378 = vmatpush3.bf16.msra.mxu0 %v2635_v18  ;;  %2171 = vmatprep.mubr.msk.f32.mxu0 %vm2528_vm0, %v2529_v1 }
 0x4a0   :  { %2379 = vmatprep.subr.bf16.mxu0 %v2527_v0 }
 0x4a3   :  { %2381 = vmatpush3.bf16.msra.mxu0 %v2647_v22  ;;  %v937_v22 = vld [vmem:[%s2974_s6] sm:$0xff] }
 0x4a4   :  { %2398 = vmatprep.subr.bf16.mxu0 %v2527_v0  ;;  %v2382_v25 = vpack.c.bf16 %v938_v24, %v937_v22 }
 0x4a5   :  { %v950_v48 = vld [vmem:[#allocation2 + $0x20] sm:$0xff] }
 0x4a6   :  { %2383 = vmatprep.subr.bf16.mxu1 %v2382_v25 }
 0x571   :  { %v774_v15 = vpop.f32.mrb[8].mxu0 }
 0x572   :  { %v778_v16 = vadd.f32 %v774_v15, %v2724_v53  ;;  %v2151_v17 = vpop.f32.mrb[9].mxu0 }
 0x574   :  { %2478 = vtanh.f32 %v778_v16 }
 0x57e   :  { %v2479_v19 = vpop.eup %2478 }
 0x57f   :  { %780 = vst.msk [vmem:[#allocation2 + $0x28] sm:$0xff] %vm324_vm2, %v2479_v19  ;;  %2161 = vmatmul.mubr.msk.f32.vlgmr.msra.gmra.mrb[10].mxu1 %vm324_vm2, %v2479_v19 }
 0x580   :  { %2385 = vmatpush3.bf16.msra.mxu1 %v2382_v25 }
 0x581   :  { %2387 = vmatprep.subr.bf16.mxu1 %v2386_v28 }
 0x584   :  { %2389 = vmatpush3.bf16.msra.mxu1 %v2386_v28 }
 0x585   :  { %2391 = vmatprep.subr.bf16.mxu1 %v2390_v31 }
 0x586   :  { %v951_v47 = vld [vmem:[#allocation2 + $0x28] sm:$0xff] }
 0x652   :  { %v850_v18 = vpop.f32.mrb[10].mxu1 }
 0x653   :  { %v854_v20 = vadd.f32 %v850_v18, %v2728_v59  ;;  %v2162_v21 = vpop.f32.mrb[11].mxu1 }
 0x655   :  { %2480 = vtanh.f32 %v854_v20 }
 0x65f   :  { %v2481_v23 = vpop.eup %2480 }
 0x660   :  { %856 = vst.msk [vmem:[#allocation2 + $0x30] sm:$0xff] %vm324_vm2, %v2481_v23  ;;  %2172 = vmatmul.mubr.msk.f32.vlgmr.msra.gmra.mrb[10].mxu0 %vm324_vm2, %v2481_v23 }
 0x661   :  { %2222 = vmatprep.mubr.msk.f32.mxu0 %vm2528_vm0, %v2529_v1  ;;  %2400 = vmatpush3.bf16.msra.mxu0 %v2795_v34 }
 0x662   :  { %2401 = vmatprep.subr.bf16.mxu0 %v2527_v0 }
 0x665   :  { %2403 = vmatpush3.bf16.msra.mxu0 %v2799_v37 }
 0x666   :  { %2404 = vmatprep.subr.bf16.mxu0 %v2527_v0 }
 0x667   :  { %v952_v46 = vld [vmem:[#allocation2 + $0x30] sm:$0xff] }
 0x668   :  { %2223 = vmatmul.mubr.f32.vlgmr.msra.gmra.mrb[12].mxu0 %v2529_v1 }
 0x669   :  { %2406 = vmatpush3.bf16.msra.mxu0 %v2795_v34  ;;  %2233 = vmatprep.mubr.msk.f32.mxu0 %vm2528_vm0, %v2529_v1 }
 0x66a   :  { %2407 = vmatprep.subr.bf16.mxu0 %v2527_v0 }
 0x66d   :  { %2409 = vmatpush3.bf16.msra.mxu0 %v2799_v37 }
 0x66e   :  { %2410 = vmatprep.subr.bf16.mxu0 %v2527_v0 }
 0x733   :  { %v926_v38 = vpop.f32.mrb[10].mxu0 }
 0x734   :  { %v930_v39 = vadd.f32 %v926_v38, %v2726_v57  ;;  %v2173_v40 = vpop.f32.mrb[11].mxu0 }
 0x736   :  { %2482 = vtanh.f32 %v930_v39 }
 0x73b   :  { %v1268_v53 = vpop.f32.mrb[12].mxu0 }
 0x73c   :  { %v2224_v54 = vpop.f32.mrb[13].mxu0 }
 0x740   :  { %v2483_v41 = vpop.eup %2482 }
 0x741   :  { %932 = vst.msk [vmem:[#allocation2 + $0x38] sm:$0xff] %vm324_vm2, %v2483_v41 }
 0x748   :  { %v953_v44 = vld [vmem:[#allocation2 + $0x38] sm:$0xff] }
 0x749   :  { %2182 = vmatprep.mubr.msk.f32.mxu1 %vm324_vm2, %v953_v44 }
 0x74a   :  { %2183 = vmatmul.mubr.msk.f32.vlgmr.msra.gmra.mrb[12].mxu1 %vm324_vm2, %v952_v46 }
 0x74b   :  { %2185 = vmatprep.mubr.msk.f32.mxu1 %vm324_vm2, %v951_v47  ;;  %2393 = vmatpush3.bf16.msra.mxu1 %v2390_v31 }
 0x74c   :  { %2395 = vmatprep.subr.bf16.mxu1 %v2394_v45 }
 0x74e   :  { %2186 = vmatmul.mubr.msk.f32.gmra.mrb[14].mxu1 %vm324_vm2, %v950_v48 }
 0x74f   :  { %2188 = vmatprep.mubr.msk.f32.mxu1 %vm324_vm2, %v949_v49  ;;  %2397 = vmatpush3.bf16.msra.mxu1 %v2394_v45 }
 0x750   :  { %2422 = vmatprep.subr.bf16.mxu1 %v2527_v0 }
 0x752   :  { %2189 = vmatmul.mubr.msk.f32.gmra.mrb[16].mxu1 %vm324_vm2, %v948_v50 }
 0x753   :  { %2191 = vmatprep.mubr.msk.f32.mxu1 %vm324_vm2, %v947_v51 }
 0x756   :  { %2192 = vmatmul.mubr.msk.f32.gmra.mrb[18].mxu1 %vm324_vm2, %v946_v52 }
 0x757   :  { %2202 = vmatprep.mubr.msk.f32.mxu1 %vm324_vm2, %v946_v52 }
 0x75a   :  { %2203 = vmatmul.mubr.msk.f32.vlgmr.msra.gmra.mrb[12].mxu1 %vm324_vm2, %v947_v51 }
 0x75b   :  { %2205 = vmatprep.mubr.msk.f32.mxu1 %vm324_vm2, %v948_v50  ;;  %2424 = vmatpush3.bf16.msra.mxu1 %v2795_v34 }
 0x75c   :  { %2425 = vmatprep.subr.bf16.mxu1 %v2527_v0 }
 0x75e   :  { %2206 = vmatmul.mubr.msk.f32.gmra.mrb[14].mxu1 %vm324_vm2, %v949_v49 }
 0x75f   :  { %2208 = vmatprep.mubr.msk.f32.mxu1 %vm324_vm2, %v950_v48  ;;  %2427 = vmatpush3.bf16.msra.mxu1 %v2799_v37 }
 0x760   :  { %2434 = vmatprep.subr.bf16.mxu1 %v2527_v0 }
 0x762   :  { %2209 = vmatmul.mubr.msk.f32.gmra.mrb[16].mxu1 %vm324_vm2, %v951_v47 }
 0x763   :  { %2211 = vmatprep.mubr.msk.f32.mxu1 %vm324_vm2, %v952_v46 }
 0x766   :  { %2212 = vmatmul.mubr.msk.f32.gmra.mrb[18].mxu1 %vm324_vm2, %v953_v44 }
 0x767   :  { %2266 = vmatprep.mubr.msk.f32.mxu1 %vm2528_vm0, %v2529_v1 }
 0x82d   :  { %v2204_v56 = vpop.f32.mrb[12].mxu1 }
 0x82e   :  { %v1195_v57 = vadd.f32 %v2204_v56, %v1886_v55  ;;  %v1149_v58 = vpop.f32.mrb[13].mxu1 }
 0x82f   :  { %v1194_v59 = vadd.f32 %v1886_v55, %v1149_v58 }
 0x831   :  { %v1272_v60 = vadd.f32 %v1268_v53, %v1194_v59  ;;  %v2207_v61 = vpop.f32.mrb[14].mxu1 }
 0x832   :  { %v1197_v62 = vadd.f32 %v2207_v61, %v1886_v55  ;;  %v1159_v63 = vpop.f32.mrb[15].mxu1 }
 0x833   :  { %2484 = vtanh.f32 %v1272_v60  ;;  %v1196_v2 = vadd.f32 %v1886_v55, %v1159_v63 }
 0x835   :  { %v2210_v3 = vpop.f32.mrb[16].mxu1 }
 0x836   :  { %v2844_v4 = vadd.f32 %v2210_v3, %v1886_v55  ;;  %v1169_v5 = vpop.f32.mrb[17].mxu1 }
 0x837   :  { %v1198_v6 = vadd.f32 %v1886_v55, %v1169_v5 }
 0x839   :  { %v2213_v7 = vpop.f32.mrb[18].mxu1 }
 0x83a   :  { %v2846_v8 = vadd.f32 %v2213_v7, %v1886_v55  ;;  %v1179_v9 = vpop.f32.mrb[19].mxu1 }
 0x83b   :  { %v2848_v10 = vadd.f32 %v1886_v55, %v1179_v9 }
 0x83d   :  { %v2485_v11 = vpop.eup %2484 }
 0x83e   :  { %1274 = vst.msk [vmem:[#allocation2] sm:$0xff] %vm324_vm2, %v2485_v11  ;;  %2234 = vmatmul.mubr.msk.f32.vlgmr.msra.gmra.mrb[14].mxu0 %vm324_vm2, %v2485_v11 }
 0x83f   :  { %2412 = vmatpush3.bf16.msra.mxu0 %v2795_v34  ;;  %2244 = vmatprep.mubr.msk.f32.mxu0 %vm2528_vm0, %v2529_v1 }
 0x840   :  { %2413 = vmatprep.subr.bf16.mxu0 %v2527_v0 }
 0x843   :  { %2415 = vmatpush3.bf16.msra.mxu0 %v2799_v37 }
 0x844   :  { %2416 = vmatprep.subr.bf16.mxu0 %v2527_v0 }
 0x845   :  { %v2858_v12 = vld [vmem:[#allocation2] sm:$0xff] }
 0x846   :  { %1816 = vst.msk [vmem:[%s2977_s9] sm:$0xff] %vm1815_vm3, %v2858_v12 }
 0x911   :  { %v1344_v13 = vpop.f32.mrb[14].mxu0 }
 0x912   :  { %v1348_v14 = vadd.f32 %v1344_v13, %v1195_v57  ;;  %v2235_v15 = vpop.f32.mrb[15].mxu0 }
 0x914   :  { %2486 = vtanh.f32 %v1348_v14 }
 0x91e   :  { %v2487_v16 = vpop.eup %2486 }
 0x91f   :  { %1350 = vst.msk [vmem:[#allocation2 + $0x8] sm:$0xff] %vm324_vm2, %v2487_v16  ;;  %2245 = vmatmul.mubr.msk.f32.vlgmr.msra.gmra.mrb[16].mxu0 %vm324_vm2, %v2487_v16 }
 0x920   :  { %2418 = vmatpush3.bf16.msra.mxu0 %v2795_v34  ;;  %2255 = vmatprep.mubr.msk.f32.mxu0 %vm2528_vm0, %v2529_v1 }
 0x921   :  { %2419 = vmatprep.subr.bf16.mxu0 %v2527_v0 }
 0x924   :  { %2421 = vmatpush3.bf16.msra.mxu0 %v2799_v37 }
 0x925   :  { %2428 = vmatprep.subr.bf16.mxu0 %v2527_v0 }
 0x926   :  { %v2873_v17 = vld [vmem:[#allocation2 + $0x8] sm:$0xff] }
 0x927   :  { %1817 = vst.msk [vmem:[%s2977_s9 + $0x8] sm:$0xff] %vm1815_vm3, %v2873_v17 }
 0x9f2   :  { %v1420_v19 = vpop.f32.mrb[16].mxu0 }
 0x9f3   :  { %v1424_v18 = vadd.f32 %v1420_v19, %v1196_v2  ;;  %v2246_v20 = vpop.f32.mrb[17].mxu0 }
 0x9f5   :  { %2488 = vtanh.f32 %v1424_v18 }
 0x9ff   :  { %v2489_v21 = vpop.eup %2488 }
 0xa00   :  { %1426 = vst.msk [vmem:[#allocation2 + $0x10] sm:$0xff] %vm324_vm2, %v2489_v21  ;;  %2256 = vmatmul.mubr.msk.f32.vlgmr.msra.gmra.mrb[18].mxu0 %vm324_vm2, %v2489_v21 }
 0xa01   :  { %2430 = vmatpush3.bf16.msra.mxu0 %v2795_v34  ;;  %2277 = vmatprep.mubr.msk.f32.mxu0 %vm2528_vm0, %v2529_v1 }
 0xa02   :  { %2431 = vmatprep.subr.bf16.mxu0 %v2527_v0 }
 0xa05   :  { %2433 = vmatpush3.bf16.msra.mxu0 %v2799_v37 }
 0xa06   :  { %2440 = vmatprep.subr.bf16.mxu0 %v2527_v0 }
 0xa07   :  { %v1809_v23 = vld [vmem:[#allocation2 + $0x10] sm:$0xff] }
 0xa08   :  { %1818 = vst.msk [vmem:[%s2977_s9 + $0x10] sm:$0xff] %vm1815_vm3, %v1809_v23 }
 0xad3   :  { %v1496_v22 = vpop.f32.mrb[18].mxu0 }
 0xad4   :  { %v1500_v24 = vadd.f32 %v1496_v22, %v1197_v62  ;;  %v2257_v25 = vpop.f32.mrb[19].mxu0 }
 0xad6   :  { %2490 = vtanh.f32 %v1500_v24 }
 0xae0   :  { %v2491_v26 = vpop.eup %2490 }
 0xae1   :  { %1502 = vst.msk [vmem:[#allocation2 + $0x18] sm:$0xff] %vm324_vm2, %v2491_v26  ;;  %2267 = vmatmul.mubr.msk.f32.vlgmr.msra.gmra.mrb[20].mxu1 %vm324_vm2, %v2491_v26 }
 0xae2   :  { %2436 = vmatpush3.bf16.msra.mxu1 %v2795_v34  ;;  %2288 = vmatprep.mubr.msk.f32.mxu1 %vm2528_vm0, %v2529_v1 }
 0xae3   :  { %2437 = vmatprep.subr.bf16.mxu1 %v2527_v0 }
 0xae6   :  { %2439 = vmatpush3.bf16.msra.mxu1 %v2799_v37 }
 0xae8   :  { %v1810_v27 = vld [vmem:[#allocation2 + $0x18] sm:$0xff] }
 0xae9   :  { %1819 = vst.msk [vmem:[%s2977_s9 + $0x18] sm:$0xff] %vm1815_vm3, %v1810_v27 }
 0xbb4   :  { %v1572_v28 = vpop.f32.mrb[20].mxu1 }
 0xbb5   :  { %v1576_v29 = vadd.f32 %v1572_v28, %v1198_v6  ;;  %v2268_v30 = vpop.f32.mrb[21].mxu1 }
 0xbb7   :  { %2492 = vtanh.f32 %v1576_v29 }
 0xbc1   :  { %v2493_v31 = vpop.eup %2492 }
 0xbc2   :  { %1578 = vst.msk [vmem:[#allocation2 + $0x20] sm:$0xff] %vm324_vm2, %v2493_v31  ;;  %2278 = vmatmul.mubr.msk.f32.vlgmr.msra.gmra.mrb[20].mxu0 %vm324_vm2, %v2493_v31 }
 0xbc3   :  { %2442 = vmatpush3.bf16.msra.mxu0 %v2795_v34  ;;  %2299 = vmatprep.mubr.msk.f32.mxu0 %vm2528_vm0, %v2529_v1 }
 0xbc4   :  { %2443 = vmatprep.subr.bf16.mxu0 %v2527_v0 }
 0xbc7   :  { %2445 = vmatpush3.bf16.msra.mxu0 %v2799_v37 }
 0xbc9   :  { %v1811_v32 = vld [vmem:[#allocation2 + $0x20] sm:$0xff] }
 0xbca   :  { %1820 = vst.msk [vmem:[%s2977_s9 + $0x20] sm:$0xff] %vm1815_vm3, %v1811_v32 }
 0xbcb   :  { %1836 = vst.msk [vmem:[%s2977_s9 + $0x18] sm:$0xff] %vm1832_vm4, %v1811_v32  ;;  %1837 = vst.msk [vmem:[%s2977_s9 + $0x20] sm:$0xff] %vm1832_vm4, %v1810_v27 }
 0xc95   :  { %v1648_v0 = vpop.f32.mrb[20].mxu0 }
 0xc96   :  { %v1652_v1 = vadd.f32 %v1648_v0, %v2844_v4  ;;  %v2279_v33 = vpop.f32.mrb[21].mxu0 }
 0xc98   :  { %2494 = vtanh.f32 %v1652_v1 }
 0xca2   :  { %v2495_v34 = vpop.eup %2494 }
 0xca3   :  { %1654 = vst.msk [vmem:[#allocation2 + $0x28] sm:$0xff] %vm324_vm2, %v2495_v34  ;;  %2289 = vmatmul.mubr.msk.f32.vlgmr.msra.gmra.mrb[22].mxu1 %vm324_vm2, %v2495_v34 }
 0xcaa   :  { %v1812_v35 = vld [vmem:[#allocation2 + $0x28] sm:$0xff] }
 0xcab   :  { %1821 = vst.msk [vmem:[%s2977_s9 + $0x28] sm:$0xff] %vm1815_vm3, %v1812_v35 }
 0xcac   :  { %1835 = vst.msk [vmem:[%s2977_s9 + $0x10] sm:$0xff] %vm1832_vm4, %v1812_v35  ;;  %1838 = vst.msk [vmem:[%s2977_s9 + $0x28] sm:$0xff] %vm1832_vm4, %v1809_v23 }
 0xd76   :  { %v1724_v36 = vpop.f32.mrb[22].mxu1 }
 0xd77   :  { %v1728_v37 = vadd.f32 %v1724_v36, %v2848_v10  ;;  %v2290_v38 = vpop.f32.mrb[23].mxu1 }
 0xd79   :  { %2496 = vtanh.f32 %v1728_v37 }
 0xd83   :  { %v2497_v39 = vpop.eup %2496 }
 0xd84   :  { %1730 = vst.msk [vmem:[#allocation2 + $0x30] sm:$0xff] %vm324_vm2, %v2497_v39  ;;  %2300 = vmatmul.mubr.msk.f32.vlgmr.msra.gmra.mrb[22].mxu0 %vm324_vm2, %v2497_v39 }
 0xd8b   :  { %v1813_v40 = vld [vmem:[#allocation2 + $0x30] sm:$0xff] }
 0xd8c   :  { %1822 = vst.msk [vmem:[%s2977_s9 + $0x30] sm:$0xff] %vm1815_vm3, %v1813_v40 }
 0xd8d   :  { %1834 = vst.msk [vmem:[%s2977_s9 + $0x8] sm:$0xff] %vm1832_vm4, %v1813_v40  ;;  %1839 = vst.msk [vmem:[%s2977_s9 + $0x30] sm:$0xff] %vm1832_vm4, %v2873_v17 }
 0xe57   :  { %v1800_v41 = vpop.f32.mrb[22].mxu0 }
 0xe58   :  { %v1804_v42 = vadd.f32 %v1800_v41, %v2846_v8  ;;  %v2301_v43 = vpop.f32.mrb[23].mxu0 }
 0xe5a   :  { %2498 = vtanh.f32 %v1804_v42 }
 0xe64   :  { %v2499_v44 = vpop.eup %2498 }
 0xe65   :  { %1806 = vst.msk [vmem:[#allocation2 + $0x38] sm:$0xff] %vm324_vm2, %v2499_v44 }
 0xe6c   :  { %v1814_v45 = vld [vmem:[#allocation2 + $0x38] sm:$0xff] }
 0xe6d   :  { %1823 = vst.msk [vmem:[%s2977_s9 + $0x38] sm:$0xff] %vm1815_vm3, %v1814_v45 }
 0xe6e   :  { %1833 = vst.msk [vmem:[%s2977_s9] sm:$0xff] %vm1832_vm4, %v1814_v45  ;;  %1840 = vst.msk [vmem:[%s2977_s9 + $0x38] sm:$0xff] %vm1832_vm4, %v2858_v12 }
 0xe6f   :  { %1845 = vsyncpa [#allocation4], 1 }

</bundles_post_ra>
